<compile_context>
chip_gen: v6e
topology: v6e:2x2x1
jax: 0.10.0
libtpu: 0.0.40
codegen_flags: <defaults>
</compile_context>

<pallas_src>
import math
import functools

import jax
import jax.numpy as jnp
from jax.experimental import pallas as pl
from jax.experimental.pallas import tpu as pltpu


def _attention_kernel(x_ref, wqkv_ref, o_ref, *, scale, out_size):
    # x_ref    : (bb, S, in)    -- bb batch elements handled by this grid step
    # wqkv_ref : (in, 3*out)    -- fused [Wq | Wk | Wv]
    # o_ref    : (bb, S, out)
    bb, S, in_size = x_ref.shape

    # Single fused QKV projection: collapse (bb, S) into the sublane dim so
    # the MXU runs one (bb*S, in) @ (in, 3*out) matmul instead of 3 narrow ones.
    x2d = x_ref[...].reshape(bb * S, in_size)
    qkv = jnp.dot(x2d, wqkv_ref[...], preferred_element_type=jnp.float32)
    qkv = qkv.reshape(bb, S, 3 * out_size)

    q = qkv[:, :, 0:out_size] * scale          # scale q, not the (S,S) scores
    k = qkv[:, :, out_size:2 * out_size]
    v = qkv[:, :, 2 * out_size:3 * out_size]

    # q @ k^T without materializing a transpose: batched contraction on the
    # last axis of both operands.
    scores = jnp.einsum('bqd,bkd->bqk', q, k,
                        preferred_element_type=jnp.float32)      # (bb, S, S)

    # Numerically stable softmax over the key axis.
    scores = scores - jnp.max(scores, axis=-1, keepdims=True)
    p = jnp.exp(scores)
    denom = jnp.sum(p, axis=-1, keepdims=True)
    p = p * pl.reciprocal(denom, approx=True)                    # EUP vrcp

    out = jnp.einsum('bqk,bkd->bqd', p, v,
                     preferred_element_type=jnp.float32)         # (bb, S, out)
    o_ref[...] = out.astype(o_ref.dtype)


def single_attention_like_layer(x, wq, wk, wv, *, batch_block=None):
    """x: (B, S, in_size); w*: (in_size, out_size). Returns (B, S, out_size)."""
    B, S, in_size = x.shape
    out_size = wq.shape[1]
    scale = 1.0 / math.sqrt(out_size)

    # Fuse the three projection weights into one lane-dense matrix (done once
    # in the wrapper; inside the kernel this is a single weight operand/DMA).
    wqkv = jnp.concatenate([wq, wk, wv], axis=1)        # (in, 3*out)

    # How many batch elements each grid step handles.  For small problems this
    # collapses everything into a single invocation (per-step overhead ~0.35us).
    if batch_block is None:
        batch_block = 1
        for cand in (8, 4, 2, 1):
            if B % cand == 0:
                batch_block = cand
                break
    assert B % batch_block == 0, "batch_block must divide B"
    grid = (B // batch_block,)

    kernel = functools.partial(_attention_kernel, scale=scale, out_size=out_size)

    return pl.pallas_call(
        kernel,
        out_shape=jax.ShapeDtypeStruct((B, S, out_size), x.dtype),
        grid_spec=pltpu.PrefetchScalarGridSpec(
            num_scalar_prefetch=0,
            grid=grid,
            in_specs=[
                pl.BlockSpec((batch_block, S, in_size), lambda b: (b, 0, 0)),
                pl.BlockSpec((in_size, 3 * out_size), lambda b: (0, 0)),
            ],
            out_specs=pl.BlockSpec((batch_block, S, out_size), lambda b: (b, 0, 0)),
        ),
        compiler_params=pltpu.CompilerParams(
            dimension_semantics=("parallel",),
        ),
    )(x, wqkv)


def xavier_uniform(key, fan_in, fan_out, dtype=jnp.float32):
    # Matches torch.nn.init.xavier_uniform_ for a (out, in) Linear weight;
    # generated directly in (in, out) layout (bound is symmetric).
    bound = math.sqrt(6.0 / (fan_in + fan_out))
    return jax.random.uniform(key, (fan_in, fan_out), dtype,
                              minval=-bound, maxval=bound)


def reference(x, wq, wk, wv):
    q = x @ wq
    k = x @ wk
    v = x @ wv
    scores = (q @ jnp.swapaxes(k, -1, -2)) / math.sqrt(wq.shape[1])
    p = jax.nn.softmax(scores, axis=-1)
    return p @ v


if __name__ == "__main__":
    B, S, in_size, out_size = 2, 8, 32, 32

    key = jax.random.PRNGKey(0)
    kx, kq, kk, kv = jax.random.split(key, 4)

    x = jax.random.normal(kx, (B, S, in_size), dtype=jnp.float32)
    wq = xavier_uniform(kq, in_size, out_size)
    wk = xavier_uniform(kk, in_size, out_size)
    wv = xavier_uniform(kv, in_size, out_size)

    out = single_attention_like_layer(x, wq, wk, wv)
    out = jax.block_until_ready(out)

    ref = reference(x, wq, wk, wv)
    assert out.shape == (B, S, out_size)
    # Tolerance reflects the approximate EUP reciprocal used for the softmax
    # normalization (precision tradeoff flagged in the perf review).
    assert jnp.allclose(out, ref, atol=5e-3, rtol=5e-3), "mismatch vs reference"

    print("KERNEL_OK")
</pallas_src>

<mosaic_0001>
module attributes {stable_mosaic.version = 11 : i64} {
  func.func @_attention_kernel(%arg0: i32, %arg1: memref<2x8x32xf32, #tpu.memory_space<vmem>>, %arg2: memref<32x96xf32, #tpu.memory_space<vmem>>, %arg3: memref<2x8x32xf32, #tpu.memory_space<vmem>>) attributes {dimension_semantics = [#tpu.dimension_semantics<parallel>], iteration_bounds = array<i64: 1>, scalar_prefetch = 0 : i64, scratch_operands = 0 : i64, tpu.core_type = #tpu.core_type<tc>, window_params = [{transform_indices = @transform_0, window_bounds = array<i64: 2, 8, 32>}, {pipeline_mode = #tpu.pipeline_mode<synchronous>, transform_indices = @transform_1, window_bounds = array<i64: 32, 96>}, {transform_indices = @transform_2, window_bounds = array<i64: 2, 8, 32>}]} {
    %c0 = arith.constant 0 : index
    %c0_0 = arith.constant 0 : index
    %c0_1 = arith.constant 0 : index
    %0 = vector.load %arg1[%c0, %c0_0, %c0_1] : memref<2x8x32xf32, #tpu.memory_space<vmem>>, vector<2x8x32xf32>
    %1 = vector.shape_cast %0 : vector<2x8x32xf32> to vector<16x32xf32>
    %c0_2 = arith.constant 0 : index
    %c0_3 = arith.constant 0 : index
    %2 = vector.load %arg2[%c0_2, %c0_3] : memref<32x96xf32, #tpu.memory_space<vmem>>, vector<32x96xf32>
    %cst = arith.constant dense<0.000000e+00> : vector<16x96xf32>
    %3 = tpu.matmul %1, %2, %cst {dimension_numbers = #tpu.dot_dimension_numbers<[1], [0], [0], [1], [0, 0, 1, 1], [], []>} : vector<16x32xf32>, vector<32x96xf32>, vector<16x96xf32> -> vector<16x96xf32>
    %4 = vector.shape_cast %3 : vector<16x96xf32> to vector<2x8x96xf32>
    %5 = vector.extract_strided_slice %4 {offsets = [0, 0, 0], sizes = [2, 8, 32], strides = [1, 1, 1]} : vector<2x8x96xf32> to vector<2x8x32xf32>
    %cst_4 = arith.constant 0.176776692 : f32
    %6 = vector.broadcast %cst_4 : f32 to vector<2x8x32xf32>
    %7 = arith.mulf %5, %6 : vector<2x8x32xf32>
    %8 = vector.extract_strided_slice %4 {offsets = [0, 0, 32], sizes = [2, 8, 32], strides = [1, 1, 1]} : vector<2x8x96xf32> to vector<2x8x32xf32>
    %9 = vector.extract_strided_slice %4 {offsets = [0, 0, 64], sizes = [2, 8, 32], strides = [1, 1, 1]} : vector<2x8x96xf32> to vector<2x8x32xf32>
    "tpu.trace_start"() <{level = 10 : i32, message = "bqd,bkd->bqk"}> : () -> ()
    %cst_5 = arith.constant dense<0.000000e+00> : vector<2x8x8xf32>
    %10 = tpu.matmul %7, %8, %cst_5 {dimension_numbers = #tpu.dot_dimension_numbers<[2], [2], [1], [1], [0, 0, 0, 1, 1, 1], [0], [0]>} : vector<2x8x32xf32>, vector<2x8x32xf32>, vector<2x8x8xf32> -> vector<2x8x8xf32>
    "tpu.trace_stop"() : () -> ()
    %cst_6 = arith.constant dense<0xFF800000> : vector<2x8xf32>
    %11 = vector.multi_reduction <maximumf>, %10, %cst_6 [2] : vector<2x8x8xf32> to vector<2x8xf32>
    %12 = vector.shape_cast %11 : vector<2x8xf32> to vector<2x8x1xf32>
    %13 = vector.broadcast %12 : vector<2x8x1xf32> to vector<2x8x8xf32>
    %14 = arith.subf %10, %13 : vector<2x8x8xf32>
    %15 = math.exp %14 : vector<2x8x8xf32>
    %cst_7 = arith.constant dense<0.000000e+00> : vector<2x8xf32>
    %16 = vector.multi_reduction <add>, %15, %cst_7 [2] : vector<2x8x8xf32> to vector<2x8xf32>
    %17 = vector.shape_cast %16 : vector<2x8xf32> to vector<2x8x1xf32>
    %18 = tpu.reciprocal %17 {approx = true} : vector<2x8x1xf32> -> vector<2x8x1xf32>
    %19 = vector.broadcast %18 : vector<2x8x1xf32> to vector<2x8x8xf32>
    %20 = arith.mulf %15, %19 : vector<2x8x8xf32>
    "tpu.trace_start"() <{level = 10 : i32, message = "bqk,bkd->bqd"}> : () -> ()
    %cst_8 = arith.constant dense<0.000000e+00> : vector<2x8x32xf32>
    %21 = tpu.matmul %20, %9, %cst_8 {dimension_numbers = #tpu.dot_dimension_numbers<[2], [1], [1], [2], [0, 0, 0, 1, 1, 2], [0], [0]>} : vector<2x8x8xf32>, vector<2x8x32xf32>, vector<2x8x32xf32> -> vector<2x8x32xf32>
    "tpu.trace_stop"() : () -> ()
    %c0_9 = arith.constant 0 : index
    %c0_10 = arith.constant 0 : index
    %c0_11 = arith.constant 0 : index
    %22 = vector.load %arg3[%c0_9, %c0_10, %c0_11] : memref<2x8x32xf32, #tpu.memory_space<vmem>>, vector<2x8x32xf32>
    tpu.vector_store %arg3[%c0_9, %c0_10, %c0_11], %21 {strides = array<i32>} : memref<2x8x32xf32, #tpu.memory_space<vmem>>, vector<2x8x32xf32>,
    return
  }
  func.func @transform_0(%arg0: i32) -> (i32, i32, i32) {
    %c0_i32 = arith.constant 0 : i32
    %c0_i32_0 = arith.constant 0 : i32
    %c0_i32_1 = arith.constant 0 : i32
    return %arg0, %c0_i32, %c0_i32_0 : i32, i32, i32
  }
  func.func @transform_1(%arg0: i32) -> (i32, i32) {
    %c0_i32 = arith.constant 0 : i32
    %c0_i32_0 = arith.constant 0 : i32
    %c0_i32_1 = arith.constant 0 : i32
    return %c0_i32, %c0_i32_0 : i32, i32
  }
  func.func @transform_2(%arg0: i32) -> (i32, i32, i32) {
    %c0_i32 = arith.constant 0 : i32
    %c0_i32_0 = arith.constant 0 : i32
    %c0_i32_1 = arith.constant 0 : i32
    return %arg0, %c0_i32, %c0_i32_0 : i32, i32, i32
  }
}

</mosaic_0001>

<bundles_post_ra>
// kernel: tpu_custom_call.1
= control target key start
LH: loop header
LB: loop body
LE: loop exit
PB: predicated region body
PF: predicated region fallthrough
CT: control target
= control target key end

     0   :  { %7 = vsyncpa [#allocation3], 0  ;;  %s677_s0 = inlined_call_operand.hbm [shape: f32[2,8,32], index: 0, kind: input, shape index: {}]   ;;  %s678_s1 = inlined_call_operand.hbm [shape: f32[32,96], index: 1, kind: input, shape index: {}]   ;;  %s679_s2 = inlined_call_operand.hbm [shape: f32[2,8,32], index: 2, kind: output, shape index: {}]  }
   0x1   :  { %8 = vsyncpa [#allocation6], 0 }
   0x2   :  { %9 = vsyncpa [#allocation4], 0  ;;  %s617_s9 = smov [#allocation2]  }
   0x3   :  { %s15_s10 = sshll.u32 %s617_s9, 4  ;;  %s16_s10 = int_to_ptr.vmem [resolvable:$true] %s15_s10 }
   0x4   :  { %s559_s11 = scalar_lea.vmem %s16_s10, 256  ;;  %p564_p1 = scmp.lt.s32.totalorder %s16_s10, %s16_s10 }
   0x5   :  { %p560_p0 = scmp.ne.s32.totalorder %s16_s10, %s559_s11  ;;  %p565_p2 = scmp.lt.s32.totalorder %s559_s11, %s559_s11 }
   0x7   :  { %p566_p3 = por %p565_p2, %p564_p1 }
   0x9   :  { %p567_p4 = pnand %p566_p3, %p560_p0 }
   0xb   :  { %570 = shalt.err (!%p567_p4)
}
   0xc   :  { %s618_s12 = smov 128   ;;  %s619_s13 = smov 8  }
   0xd   :  { %21 = dma.hbm_to_vmem [thread:$0]  %s677_s0, 256, %s16_s10, [#allocation3], %s618_s12, %s618_s12, %s619_s13  }
   0xe   :  { %s620_s16 = smov [#allocation5]  }
   0xf   :  { %s27_s17 = sshll.u32 %s620_s16, 4  ;;  %s28_s17 = int_to_ptr.vmem [resolvable:$true] %s27_s17 }
  0x10   :  { %s579_s18 = scalar_lea.vmem %s28_s17, 512  ;;  %p584_p6 = scmp.lt.s32.totalorder %s28_s17, %s28_s17 }
  0x11   :  { %p580_p5 = scmp.ne.s32.totalorder %s28_s17, %s579_s18  ;;  %p585_p7 = scmp.lt.s32.totalorder %s579_s18, %s579_s18 }
  0x13   :  { %p586_p8 = por %p585_p7, %p584_p6 }
  0x15   :  { %p587_p9 = pnand %p586_p8, %p580_p5 }
  0x17   :  { %590 = shalt.err (!%p587_p9)
}
  0x18   :  { %33 = dma.hbm_to_vmem [thread:$0]  %s678_s1, 512, %s28_s17, [#allocation6], %s618_s12, %s618_s12, %s619_s13  }
  0x19   :  { %611 = dma.done.wait [#allocation3], 256  }
  0x1a   :  { %612 = vsyncadd [#allocation3], 4294967040 }
  0x1b   :  { %613 = dma.done.wait [#allocation6], 512  }
  0x1c   :  { %614 = vsyncadd [#allocation6], 4294966784  ;;  %vm46_vm0 = vcmask 261120   ;;  %v45_v0 = vld [vmem:[#allocation5 + $0x18] sm:$0xff]  ;;  %v44_v1 = vld [vmem:[#allocation5 + $0x10] sm:$0xff]  ;;  %v621_v6 = vmov 0.0  }
  0x1d   :  { %503 = vmatprep.subr.mxu0 %v45_v0  ;;  %v40_v2 = vld [vmem:[#allocation2] sm:$0xff]  ;;  %v43_v3 = vld [vmem:[#allocation5 + $0x8] sm:$0xff]  ;;  %v42_v4 = vld [vmem:[#allocation5] sm:$0xff]  ;;  %514 = vmatprep.subr.mxu1 %v621_v6  ;;  %vm622_vm1 = vmmov 0   ;;  %s623_s0 = smov 96   ;;  %vm286_vm2 = vcmask 64512  }
  0x1e   :  { %504 = vmatpush3.msra.mxu0 %v45_v0  ;;  %511 = vmatprep.mubr.msk.f32.mxu0 %vm46_vm0, %v40_v2  ;;  %v41_v5 = vld [vmem:[#allocation2 + $0x8] sm:$0xff]  ;;  %s624_s1 = smov 64   ;;  %s625_s21 = smov [#allocation7]  }
  0x1f   :  { %505 = vmatprep.subr.mxu0 %v44_v1  ;;  %516 = vmatprep.mubr.msk.f32.mxu1 %vm622_vm1, %v621_v6  ;;  %s468_s22 = sshll.u32 %s625_s21, 4  ;;  %s469_s22 = int_to_ptr.vmem [resolvable:$true] %s468_s22 }
  0x20   :  { %506 = vmatpush3.msra.mxu0 %v44_v1  ;;  %s591_s23 = scalar_lea.vmem %s469_s22, 256  ;;  %p596_p11 = scmp.lt.s32.totalorder %s469_s22, %s469_s22 }
  0x21   :  { %507 = vmatprep.subr.mxu0 %v43_v3  ;;  %p592_p10 = scmp.ne.s32.totalorder %s469_s22, %s591_s23  ;;  %p597_p12 = scmp.lt.s32.totalorder %s591_s23, %s591_s23 }
  0x22   :  { %508 = vmatpush3.msra.mxu0 %v43_v3 }
  0x23   :  { %509 = vmatprep.subr.mxu0 %v42_v4  ;;  %p598_p13 = por %p597_p12, %p596_p11 }
  0x24   :  { %510 = vmatpush3.msra.mxu0 %v42_v4 }
  0x25   :  { %512 = vmatmul.mubr.msk.f32.vlgmr.msra.gmra.mxu0 %vm46_vm0, %v41_v5  ;;  %524 = vmatprep.subr.mxu0 %v621_v6  ;;  %p599_p0 = pnand %p598_p13, %p592_p10 }
  0x26   :  { %526 = vmatprep.mubr.msk.f32.mxu0 %vm622_vm1, %v621_v6 }
  0xe5   :  { %v513_v7 = vpop.f32.mrf.mxu0 }
  0xe6   :  { %v129_v12 = vmul.f32 0.17677669, %v513_v7 }
  0xe7   :  { %v119_v8 = vpop.f32.mrf.mxu0 }
  0xe8   :  { %131 = vrot.lane.b32.xlu0 %v119_v8, %s623_s0  ;;  %v128_v10 = vmul.f32 0.17677669, %v119_v8 }
  0xec   :  { %209 = vrot.lane.b32.xlu0 %v513_v7, %s623_s0 }
 0x15a   :  { %v132_v9 = vpop.permute.xlu0 %131 }
 0x15b   :  { %515 = vmatpush3.xpose.msk.msra.mxu1 %vm46_vm0, %v132_v9 }
 0x15c   :  { %519 = vmatprep.subr.mxu1 %v621_v6 }
 0x15e   :  { %v210_v11 = vpop.permute.xlu0 %209  ;;  %517 = vmatmul.mubr.msk.f32.vlgmr.msra.gmra.mxu1 %vm46_vm0, %v128_v10 }
 0x15f   :  { %520 = vmatpush3.xpose.msk.msra.mxu1 %vm46_vm0, %v210_v11  ;;  %521 = vmatprep.mubr.msk.f32.mxu1 %vm622_vm1, %v621_v6 }
 0x160   :  { %529 = vmatprep.subr.mxu1 %v621_v6 }
 0x162   :  { %522 = vmatmul.mubr.msk.f32.vlgmr.msra.gmra.mxu1 %vm46_vm0, %v129_v12 }
 0x163   :  { %531 = vmatprep.mubr.msk.f32.mxu1 %vm622_vm1, %v621_v6 }
 0x21e   :  { %v204_v13 = vpop.f32.mrf.mxu1 }
 0x21f   :  { %v287_v14 = vsel %vm286_vm2, %v204_v13, -inf }
 0x220   :  { %288 = vmax.xlane.f32.xlu1 %v287_v14  ;;  %v518_v15 = vpop.f32.mrf.mxu1 }
 0x222   :  { %v282_v16 = vpop.f32.mrf.mxu1 }
 0x223   :  { %v290_v17 = vsel %vm286_vm2, %v282_v16, -inf }
 0x224   :  { %291 = vmax.xlane.f32.xlu1 %v290_v17  ;;  %v523_v18 = vpop.f32.mrf.mxu1 }
 0x235   :  { %309 = vrot.lane.b32.xlu1 %v119_v8, %s624_s1 }
 0x2a9   :  { %v289_v19 = vpop.xlane.xlu1 %288 }
 0x2aa   :  { %v293_v20 = vsub.f32 %v204_v13, %v289_v19 }
 0x2ac   :  { %v295_v21 = vmul.f32 1.442695, %v293_v20 }
 0x2ad   :  { %v292_v22 = vpop.xlane.xlu1 %291 }
 0x2ae   :  { %543 = vpow2.f32 %v295_v21  ;;  %v294_v23 = vsub.f32 %v282_v16, %v292_v22 }
 0x2b0   :  { %v297_v24 = vmul.f32 1.442695, %v294_v23 }
 0x2b1   :  { %v310_v25 = vpop.permute.xlu1 %309 }
 0x2b2   :  { %545 = vpow2.f32 %v297_v24  ;;  %525 = vmatpush3.msra.mxu0 %v310_v25 }
 0x2bb   :  { %v544_v26 = vpop.eup %543 }
 0x2bc   :  { %v299_v27 = vsel %vm286_vm2, %v544_v26, 0.0 }
 0x2bd   :  { %300 = vadd.xlane.f32.xlu0 %v299_v27 }
 0x2bf   :  { %v546_v28 = vpop.eup %545 }
 0x2c0   :  { %v302_v29 = vsel %vm286_vm2, %v546_v28, 0.0 }
 0x2c1   :  { %303 = vadd.xlane.f32.xlu1 %v302_v29 }
 0x2d2   :  { %385 = vrot.lane.b32.xlu1 %v513_v7, %s624_s1 }
 0x346   :  { %v301_v30 = vpop.xlane.xlu0 %300 }
 0x347   :  { %547 = vrcp.f32 %v301_v30 }
 0x34a   :  { %v304_v31 = vpop.xlane.xlu1 %303 }
 0x34b   :  { %549 = vrcp.f32 %v304_v31 }
 0x34e   :  { %v386_v32 = vpop.permute.xlu1 %385 }
 0x34f   :  { %530 = vmatpush3.msra.mxu1 %v386_v32 }
 0x354   :  { %v548_v33 = vpop.eup %547 }
 0x355   :  { %v307_v34 = vmul.f32 %v548_v33, %v544_v26 }
 0x357   :  { %527 = vmatmul.mubr.msk.f32.vlgmr.msra.gmra.mxu0 %vm286_vm2, %v307_v34 }
 0x358   :  { %v550_v35 = vpop.eup %549 }
 0x359   :  { %v308_v36 = vmul.f32 %v550_v35, %v546_v28 }
 0x35b   :  { %532 = vmatmul.mubr.msk.f32.vlgmr.msra.gmra.mxu1 %vm286_vm2, %v308_v36 }
 0x417   :  { %v381_v37 = vpop.f32.mrf.mxu0 }
 0x418   :  { %461 = vst.msk [vmem:[#allocation7] sm:$0xff] %vm46_vm0, %v381_v37 }
 0x419   :  { %v528_v38 = vpop.f32.mrf.mxu0 }
 0x41b   :  { %v457_v39 = vpop.f32.mrf.mxu1 }
 0x41c   :  { %462 = vst.msk [vmem:[#allocation7 + $0x8] sm:$0xff] %vm46_vm0, %v457_v39 }
 0x41d   :  { %v533_v40 = vpop.f32.mrf.mxu1 }
 0x41e   :  { %602 = shalt.err (!%p599_p0)
}
 0x41f   :  { %474 = dma.vmem_to_hbm [thread:$0]  %s469_s22, 256, %s679_s2, [#allocation4], %s618_s12, %s618_s12, %s619_s13  }
 0x420   :  { %615 = dma.done.wait [#allocation4], 256  }
 0x421   :  { %616 = vsyncadd [#allocation4], 4294967040 }
 0x422   :  { %478 = vsyncpa [#allocation3], 1 }
 0x423   :  { %479 = vsyncpa [#allocation6], 1 }
 0x424   :  { %480 = vsyncpa [#allocation4], 1 }

</bundles_post_ra>
